<compile_context>
chip_gen: v7x
topology: tpu7x:2x2x1
jax: 0.10.0
libtpu: 0.0.40
codegen_flags: <defaults>
</compile_context>

<pallas_src>
import functools
import math

import numpy as np
import jax
import jax.numpy as jnp
from jax.experimental import pallas as pl
from jax.experimental.pallas import tpu as pltpu

NUM_TOKENS = 64
LANE = 128


@functools.lru_cache(maxsize=None)
def _vmem_capacity_bytes() -> int:
    """Physical VMEM per core; conservative 64 MiB (v7x) fallback."""
    try:
        return int(pltpu.get_tpu_info().vmem_capacity_bytes)
    except Exception:
        return 64 << 20


def _choose_block_batch(B: int, C: int, D: int,
                        x_item: int, out_item: int, w_item: int) -> int:
    """Batch elements per grid step, derived from a VMEM budget.

    Accounts for: single-buffered resident weight + pos/bias, double-buffered
    x and out tiles. Capped at 64; keeps >=2 batch-grid steps for large B so
    the 'parallel' axis can be sharded across v7x's two TensorCores.
    """
    budget = int(_vmem_capacity_bytes() * 0.6)          # headroom for compiler scratch
    resident = C * D * w_item + NUM_TOKENS * D * 4       # weight + pos/bias (f32)
    per_batch = 2 * NUM_TOKENS * (C * x_item + D * out_item)   # double-buffered tiles
    avail = budget - resident
    tb_fit = max(1, avail // per_batch) if avail >= per_batch else 1
    tb = int(min(B, 64, tb_fit))
    if tb >= B and B >= 8:
        tb = int(pl.cdiv(B, 2))                           # keep the batch grid >= 2
    return max(1, tb)


def _vmem_limit_bytes(tb: int, tn: int, C: int,
                      x_item: int, out_item: int, w_item: int,
                      single_buffer_invariant: bool) -> int:
    w_bufs = 1 if single_buffer_invariant else 2
    est = (w_bufs * (C * tn * w_item + NUM_TOKENS * tn * 4)
           + 2 * tb * NUM_TOKENS * C * x_item
           + 2 * tb * NUM_TOKENS * tn * out_item)
    est += 8 << 20                                        # compiler scratch / semaphores
    cap = _vmem_capacity_bytes()
    return int(min(max(est, 32 << 20), int(cap * 0.9)))


def _token_embed_kernel(x_ref, w_ref, pb_ref, out_ref):
    # x_ref:   (TB, 64, C)   TB batch elements' tokens (input dtype, cast here)
    # w_ref:   (C,  TN)      projection-weight N-tile, transposed (compute dtype)
    # pb_ref:  (1, 64, TN)   pos_embed + bias N-tile (f32)
    # out_ref: (TB, 64, TN)
    tb, t, c = x_ref.shape
    tn = w_ref.shape[1]
    # One big (TB*64, C) @ (C, TN) MXU matmul instead of TB tiny 64-row matmuls.
    # Merging leading dims (64 is a multiple of 8, last dim unchanged) is
    # layout-preserving in VMEM.  Cast to the weight dtype per-tile (no wrapper
    # pass over x); accumulation stays f32.
    x2 = x_ref[...].reshape(tb * t, c).astype(w_ref.dtype)
    proj = jnp.dot(x2, w_ref[...], preferred_element_type=jnp.float32)   # (TB*64, TN)
    proj = proj.reshape(tb, t, tn) + pb_ref[...]                          # f32 add, bcast TB
    out_ref[...] = proj.astype(out_ref.dtype)


@functools.partial(jax.jit,
                   static_argnames=("tb", "tn", "out_dtype", "single_buffer"))
def _embed_pallas(x, w_t, pos_bias, *, tb, tn, out_dtype, single_buffer):
    B, T, C = x.shape
    D = w_t.shape[1]
    nb = pl.cdiv(B, tb)
    nn = pl.cdiv(D, tn)

    x_item = np.dtype(x.dtype).itemsize
    w_item = np.dtype(w_t.dtype).itemsize
    out_item = np.dtype(out_dtype).itemsize

    # Single-buffer grid-invariant operands (weight + pos/bias) when their
    # index map is constant across the grid.
    invariant = single_buffer and nn == 1
    wp_kwargs = dict(pipeline_mode=pl.Buffered(1)) if invariant else {}

    vmem_limit = _vmem_limit_bytes(tb, tn, C, x_item, out_item, w_item, invariant)

    # TODO(synk): for very large C (f32/bf16 weight >> VMEM budget) add a
    # K-tiling grid axis with a VMEM accumulator so the full weight need not
    # reside in VMEM.
    return pl.pallas_call(
        _token_embed_kernel,
        out_shape=jax.ShapeDtypeStruct((B, T, D), out_dtype),
        grid_spec=pltpu.PrefetchScalarGridSpec(
            num_scalar_prefetch=0,
            grid=(nb, nn),
            in_specs=[
                pl.BlockSpec((tb, T, C), lambda i, j: (i, 0, 0)),            # x batch tile
                pl.BlockSpec((C, tn), lambda i, j: (0, j), **wp_kwargs),      # weight
                pl.BlockSpec((1, T, tn), lambda i, j: (0, 0, j), **wp_kwargs),  # pos+bias
            ],
            out_specs=pl.BlockSpec((tb, T, tn), lambda i, j: (i, 0, j)),
        ),
        compiler_params=pltpu.CompilerParams(
            dimension_semantics=("parallel", "parallel"),
            vmem_limit_bytes=vmem_limit,
        ),
        cost_estimate=pl.CostEstimate(
            flops=2 * B * T * C * D,
            transcendentals=0,
            bytes_accessed=(x_item * B * T * C
                            + w_item * C * D
                            + 4 * T * D
                            + out_item * B * T * D),
        ),
    )(x, w_t, pos_bias)


class SimpleTokenEmbedderPallas:
    """JAX/Pallas port of SimpleTokenEmbedder (pre-tokenized 64-token embedder)."""

    def __init__(self, in_channels: int, embed_dim: int, key,
                 compute_dtype=jnp.bfloat16, out_dtype=None):
        self.in_channels = in_channels
        self.embed_dim = embed_dim
        self.compute_dtype = compute_dtype
        self.out_dtype = compute_dtype if out_dtype is None else out_dtype

        k_w, k_b, k_p = jax.random.split(key, 3)
        # nn.Linear default init: U(-1/sqrt(fan_in), 1/sqrt(fan_in))
        bound = 1.0 / math.sqrt(in_channels)
        # Reference-facing params (PyTorch semantics, f32):
        self.weight_t = jax.random.uniform(
            k_w, (in_channels, embed_dim), jnp.float32, -bound, bound)   # W^T, (C, D)
        self.bias = jax.random.uniform(
            k_b, (embed_dim,), jnp.float32, -bound, bound)
        # nn.Parameter(torch.randn(1, 64, embed_dim) * 0.02)
        self.pos_embed = (
            jax.random.normal(k_p, (1, NUM_TOKENS, embed_dim), jnp.float32) * 0.02)

        # Kernel-side parameters (built once): weight in compute dtype,
        # bias folded into pos_embed (kept f32 so the add happens in f32).
        self.w_kernel = self.weight_t.astype(compute_dtype)
        self.pos_bias_kernel = self.pos_embed + self.bias                 # (1, 64, D) f32

        self._single_buffer_ok = None   # resolved on first call (Buffered(1) fallback)

    def _run(self, x, tb, tn):
        kwargs = dict(tb=tb, tn=tn, out_dtype=self.out_dtype)
        if self._single_buffer_ok is not False:
            try:
                out = _embed_pallas(x, self.w_kernel, self.pos_bias_kernel,
                                    single_buffer=True, **kwargs)
                self._single_buffer_ok = True
                return out
            except Exception:
                # pipeline_mode=pl.Buffered(1) not supported by this Pallas build;
                # fall back to default (double-buffered) specs.
                self._single_buffer_ok = False
        return _embed_pallas(x, self.w_kernel, self.pos_bias_kernel,
                             single_buffer=False, **kwargs)

    def __call__(self, x, image_rotary_emb=None):
        batch_size, num_tokens, in_channels = x.shape
        assert num_tokens == NUM_TOKENS, f"Expected 64 tokens, got {num_tokens}"
        assert in_channels == self.in_channels, (
            f"Expected {self.in_channels} channels, got {in_channels}")
        D = self.embed_dim

        x_item = np.dtype(x.dtype).itemsize
        out_item = np.dtype(self.out_dtype).itemsize
        w_item = np.dtype(self.w_kernel.dtype).itemsize

        tb = _choose_block_batch(batch_size, in_channels, D, x_item, out_item, w_item)
        nb = pl.cdiv(batch_size, tb)
        # Small batch: split the embedding dim into two lane-aligned N-tiles so
        # both of v7x's TensorCores get work (no-op on 1-TC chips).
        tn = D // 2 if (nb == 1 and D >= 256 and D % 256 == 0) else D

        embedded = self._run(x, tb, tn)   # exact (B, 64, D) shape -- no slice needed

        attention_mask = jnp.ones((batch_size, num_tokens), dtype=jnp.bool_)
        img_size = [(8, 8)] * batch_size
        return embedded, attention_mask, img_size, image_rotary_emb


if __name__ == "__main__":
    key = jax.random.PRNGKey(0)
    k_param, k_x = jax.random.split(key)

    in_channels = 32
    embed_dim = 32
    batch = 2

    x = jax.random.normal(k_x, (batch, NUM_TOKENS, in_channels), jnp.float32)

    # Tight numerical check: f32 compute + f32 output.
    module = SimpleTokenEmbedderPallas(in_channels, embed_dim, k_param,
                                       compute_dtype=jnp.float32,
                                       out_dtype=jnp.float32)
    embedded, attn_mask, img_size, rot = module(x)
    embedded = jax.block_until_ready(embedded)

    ref = (jnp.einsum("btc,cd->btd", x, module.weight_t)
           + module.bias + module.pos_embed)
    assert embedded.shape == (batch, NUM_TOKENS, embed_dim)
    assert embedded.dtype == jnp.float32
    assert attn_mask.shape == (batch, NUM_TOKENS) and attn_mask.dtype == jnp.bool_
    assert img_size == [(8, 8)] * batch and rot is None
    assert jnp.allclose(embedded, ref, atol=1e-4, rtol=1e-4)

    # Production-default path: bf16 matmul operands + bf16 output
    # (f32 accumulation / f32 pos+bias add), looser tolerance.
    module_bf16 = SimpleTokenEmbedderPallas(in_channels, embed_dim, k_param)
    emb_bf16, *_ = module_bf16(x)
    emb_bf16 = jax.block_until_ready(emb_bf16)
    assert emb_bf16.shape == (batch, NUM_TOKENS, embed_dim)
    assert emb_bf16.dtype == jnp.bfloat16
    assert jnp.allclose(emb_bf16.astype(jnp.float32), ref, atol=5e-2, rtol=5e-2)

    print("KERNEL_OK")
</pallas_src>

<mosaic_0001>
module attributes {stable_mosaic.version = 11 : i64} {
  func.func @_token_embed_kernel(%arg0: i32, %arg1: i32, %arg2: memref<2x64x32xf32, #tpu.memory_space<vmem>>, %arg3: memref<32x32xf32, #tpu.memory_space<vmem>>, %arg4: memref<1x64x32xf32, #tpu.memory_space<vmem>>, %arg5: memref<2x64x32xf32, #tpu.memory_space<vmem>>) attributes {dimension_semantics = [#tpu.dimension_semantics<parallel>, #tpu.dimension_semantics<parallel>], iteration_bounds = array<i64: 1, 1>, scalar_prefetch = 0 : i64, scratch_operands = 0 : i64, tpu.core_type = #tpu.core_type<tc>, window_params = [{transform_indices = @transform_0, window_bounds = array<i64: 2, 64, 32>}, {pipeline_mode = #tpu.pipeline_mode<synchronous>, transform_indices = @transform_1, window_bounds = array<i64: 32, 32>}, {pipeline_mode = #tpu.pipeline_mode<synchronous>, transform_indices = @transform_2, window_bounds = array<i64: 1, 64, 32>}, {transform_indices = @transform_3, window_bounds = array<i64: 2, 64, 32>}]} {
    %c0 = arith.constant 0 : index
    %c0_0 = arith.constant 0 : index
    %c0_1 = arith.constant 0 : index
    %0 = vector.load %arg2[%c0, %c0_0, %c0_1] : memref<2x64x32xf32, #tpu.memory_space<vmem>>, vector<2x64x32xf32>
    %1 = vector.shape_cast %0 : vector<2x64x32xf32> to vector<128x32xf32>
    %c0_2 = arith.constant 0 : index
    %c0_3 = arith.constant 0 : index
    %2 = vector.load %arg3[%c0_2, %c0_3] : memref<32x32xf32, #tpu.memory_space<vmem>>, vector<32x32xf32>
    %cst = arith.constant dense<0.000000e+00> : vector<128x32xf32>
    %3 = tpu.matmul %1, %2, %cst {dimension_numbers = #tpu.dot_dimension_numbers<[1], [0], [0], [1], [0, 0, 1, 1], [], []>} : vector<128x32xf32>, vector<32x32xf32>, vector<128x32xf32> -> vector<128x32xf32>
    %4 = vector.shape_cast %3 : vector<128x32xf32> to vector<2x64x32xf32>
    %c0_4 = arith.constant 0 : index
    %c0_5 = arith.constant 0 : index
    %c0_6 = arith.constant 0 : index
    %5 = vector.load %arg4[%c0_4, %c0_5, %c0_6] : memref<1x64x32xf32, #tpu.memory_space<vmem>>, vector<1x64x32xf32>
    %6 = vector.broadcast %5 : vector<1x64x32xf32> to vector<2x64x32xf32>
    %7 = arith.addf %4, %6 : vector<2x64x32xf32>
    %c0_7 = arith.constant 0 : index
    %c0_8 = arith.constant 0 : index
    %c0_9 = arith.constant 0 : index
    %8 = vector.load %arg5[%c0_7, %c0_8, %c0_9] : memref<2x64x32xf32, #tpu.memory_space<vmem>>, vector<2x64x32xf32>
    tpu.vector_store %arg5[%c0_7, %c0_8, %c0_9], %7 {strides = array<i32>} : memref<2x64x32xf32, #tpu.memory_space<vmem>>, vector<2x64x32xf32>,
    return
  }
  func.func @transform_0(%arg0: i32, %arg1: i32) -> (i32, i32, i32) {
    %c0_i32 = arith.constant 0 : i32
    %c0_i32_0 = arith.constant 0 : i32
    %c0_i32_1 = arith.constant 0 : i32
    return %arg0, %c0_i32, %c0_i32_0 : i32, i32, i32
  }
  func.func @transform_1(%arg0: i32, %arg1: i32) -> (i32, i32) {
    %c0_i32 = arith.constant 0 : i32
    %c0_i32_0 = arith.constant 0 : i32
    return %c0_i32, %arg1 : i32, i32
  }
  func.func @transform_2(%arg0: i32, %arg1: i32) -> (i32, i32, i32) {
    %c0_i32 = arith.constant 0 : i32
    %c0_i32_0 = arith.constant 0 : i32
    %c0_i32_1 = arith.constant 0 : i32
    return %c0_i32, %c0_i32_0, %arg1 : i32, i32, i32
  }
  func.func @transform_3(%arg0: i32, %arg1: i32) -> (i32, i32, i32) {
    %c0_i32 = arith.constant 0 : i32
    %c0_i32_0 = arith.constant 0 : i32
    return %arg0, %c0_i32, %arg1 : i32, i32, i32
  }
}

module attributes {stable_mosaic.version = 11 : i64} {
  func.func @_token_embed_kernel(%arg0: i32, %arg1: i32, %arg2: memref<2x64x32xf32, #tpu.memory_space<vmem>>, %arg3: memref<32x32xf32, #tpu.memory_space<vmem>>, %arg4: memref<1x64x32xf32, #tpu.memory_space<vmem>>, %arg5: memref<2x64x32xf32, #tpu.memory_space<vmem>>) attributes {dimension_semantics = [#tpu.dimension_semantics<parallel>, #tpu.dimension_semantics<parallel>], iteration_bounds = array<i64: 1, 1>, scalar_prefetch = 0 : i64, scratch_operands = 0 : i64, tpu.core_type = #tpu.core_type<tc>, window_params = [{transform_indices = @transform_0, window_bounds = array<i64: 2, 64, 32>}, {transform_indices = @transform_1, window_bounds = array<i64: 32, 32>}, {transform_indices = @transform_2, window_bounds = array<i64: 1, 64, 32>}, {transform_indices = @transform_3, window_bounds = array<i64: 2, 64, 32>}]} {
    %c0 = arith.constant 0 : index
    %c0_0 = arith.constant 0 : index
    %c0_1 = arith.constant 0 : index
    %0 = vector.load %arg2[%c0, %c0_0, %c0_1] : memref<2x64x32xf32, #tpu.memory_space<vmem>>, vector<2x64x32xf32>
    %1 = vector.shape_cast %0 : vector<2x64x32xf32> to vector<128x32xf32>
    %c0_2 = arith.constant 0 : index
    %c0_3 = arith.constant 0 : index
    %2 = vector.load %arg3[%c0_2, %c0_3] : memref<32x32xf32, #tpu.memory_space<vmem>>, vector<32x32xf32>
    %cst = arith.constant dense<0.000000e+00> : vector<128x32xf32>
    %3 = tpu.matmul %1, %2, %cst {dimension_numbers = #tpu.dot_dimension_numbers<[1], [0], [0], [1], [0, 0, 1, 1], [], []>} : vector<128x32xf32>, vector<32x32xf32>, vector<128x32xf32> -> vector<128x32xf32>
    %4 = vector.shape_cast %3 : vector<128x32xf32> to vector<2x64x32xf32>
    %c0_4 = arith.constant 0 : index
    %c0_5 = arith.constant 0 : index
    %c0_6 = arith.constant 0 : index
    %5 = vector.load %arg4[%c0_4, %c0_5, %c0_6] : memref<1x64x32xf32, #tpu.memory_space<vmem>>, vector<1x64x32xf32>
    %6 = vector.broadcast %5 : vector<1x64x32xf32> to vector<2x64x32xf32>
    %7 = arith.addf %4, %6 : vector<2x64x32xf32>
    %c0_7 = arith.constant 0 : index
    %c0_8 = arith.constant 0 : index
    %c0_9 = arith.constant 0 : index
    %8 = vector.load %arg5[%c0_7, %c0_8, %c0_9] : memref<2x64x32xf32, #tpu.memory_space<vmem>>, vector<2x64x32xf32>
    tpu.vector_store %arg5[%c0_7, %c0_8, %c0_9], %7 {strides = array<i32>} : memref<2x64x32xf32, #tpu.memory_space<vmem>>, vector<2x64x32xf32>,
    return
  }
  func.func @transform_0(%arg0: i32, %arg1: i32) -> (i32, i32, i32) {
    %c0_i32 = arith.constant 0 : i32
    %c0_i32_0 = arith.constant 0 : i32
    %c0_i32_1 = arith.constant 0 : i32
    return %arg0, %c0_i32, %c0_i32_0 : i32, i32, i32
  }
  func.func @transform_1(%arg0: i32, %arg1: i32) -> (i32, i32) {
    %c0_i32 = arith.constant 0 : i32
    %c0_i32_0 = arith.constant 0 : i32
    return %c0_i32, %arg1 : i32, i32
  }
  func.func @transform_2(%arg0: i32, %arg1: i32) -> (i32, i32, i32) {
    %c0_i32 = arith.constant 0 : i32
    %c0_i32_0 = arith.constant 0 : i32
    %c0_i32_1 = arith.constant 0 : i32
    return %c0_i32, %c0_i32_0, %arg1 : i32, i32, i32
  }
  func.func @transform_3(%arg0: i32, %arg1: i32) -> (i32, i32, i32) {
    %c0_i32 = arith.constant 0 : i32
    %c0_i32_0 = arith.constant 0 : i32
    return %arg0, %c0_i32, %arg1 : i32, i32, i32
  }
}

</mosaic_0001>

<bundles_post_ra>
// kernel: _embed_pallas.1
= control target key start
LH: loop header
LB: loop body
LE: loop exit
PB: predicated region body
PF: predicated region fallthrough
CT: control target
= control target key end

     0   :  { %vm34_vm0 = vcmask 261120   ;;  %s536_s1 = inlined_call_operand.vmem [shape: f32[32,32], index: 1, kind: input, shape index: {}]   ;;  %s537_s0 = inlined_call_operand.vmem [shape: f32[2,64,32], index: 0, kind: input, shape index: {}]   ;;  %s538_s2 = inlined_call_operand.vmem [shape: f32[1,64,32], index: 2, kind: input, shape index: {}]   ;;  %s539_s3 = inlined_call_operand.vmem [shape: f32[2,64,32], index: 3, kind: output, shape index: {}]  }
   0x1   :  { %v30_v0 = vld [vmem:[%s536_s1] sm:$0xff]  ;;  %v31_v1 = vld [vmem:[%s536_s1 + $0x8] sm:$0xff]  ;;  %v32_v2 = vld [vmem:[%s536_s1 + $0x10] sm:$0xff] }
   0x2   :  { %v340_v3 = vpack.c.bf16 %v31_v1, %v30_v0  ;;  %v33_v4 = vld [vmem:[%s536_s1 + $0x18] sm:$0xff]  ;;  %v14_v5 = vld [vmem:[%s537_s0] sm:$0xff]  ;;  %v15_v8 = vld [vmem:[%s537_s0 + $0x8] sm:$0xff] }
   0x3   :  { %v22_v6 = vld [vmem:[%s537_s0 + $0x40] sm:$0xff]  ;;  %v344_v7 = vpack.c.bf16 %v33_v4, %v32_v2  ;;  %316 = vmatprep.mubr.msk.f32.mxu0 %vm34_vm0, %v14_v5  ;;  %v23_v9 = vld [vmem:[%s537_s0 + $0x48] sm:$0xff]  ;;  %v16_v10 = vld [vmem:[%s537_s0 + $0x10] sm:$0xff] }
   0x4   :  { %328 = vmatprep.mubr.msk.f32.mxu1 %vm34_vm0, %v22_v6  ;;  %341 = vmatprep.subr.bf16.mxu0 %v340_v3  ;;  %v24_v11 = vld [vmem:[%s537_s0 + $0x50] sm:$0xff]  ;;  %v17_v12 = vld [vmem:[%s537_s0 + $0x18] sm:$0xff]  ;;  %v18_v14 = vld [vmem:[%s537_s0 + $0x20] sm:$0xff] }
   0x5   :  { %348 = vmatprep.subr.bf16.mxu1 %v340_v3  ;;  %343 = vmatpush3.bf16.msra.mxu0 %v340_v3  ;;  %v25_v13 = vld [vmem:[%s537_s0 + $0x58] sm:$0xff]  ;;  %v26_v15 = vld [vmem:[%s537_s0 + $0x60] sm:$0xff]  ;;  %v19_v16 = vld [vmem:[%s537_s0 + $0x28] sm:$0xff] }
   0x6   :  { %350 = vmatpush3.bf16.msra.mxu1 %v340_v3  ;;  %345 = vmatprep.subr.bf16.mxu0 %v344_v7  ;;  %v27_v17 = vld [vmem:[%s537_s0 + $0x68] sm:$0xff]  ;;  %v20_v18 = vld [vmem:[%s537_s0 + $0x30] sm:$0xff]  ;;  %v21_v20 = vld [vmem:[%s537_s0 + $0x38] sm:$0xff] }
   0x7   :  { %349 = vmatprep.subr.bf16.mxu1 %v344_v7  ;;  %v28_v19 = vld [vmem:[%s537_s0 + $0x70] sm:$0xff]  ;;  %v29_v21 = vld [vmem:[%s537_s0 + $0x78] sm:$0xff]  ;;  %v229_v22 = vld [vmem:[%s538_s2 + $0x8] sm:$0xff] }
   0x8   :  { %v228_v23 = vld [vmem:[%s538_s2] sm:$0xff]  ;;  %v231_v32 = vld [vmem:[%s538_s2 + $0x18] sm:$0xff]  ;;  %v230_v33 = vld [vmem:[%s538_s2 + $0x10] sm:$0xff] }
   0x9   :  { %347 = vmatpush3.bf16.msra.mxu0 %v344_v7  ;;  %v233_v42 = vld [vmem:[%s538_s2 + $0x28] sm:$0xff]  ;;  %v232_v43 = vld [vmem:[%s538_s2 + $0x20] sm:$0xff]  ;;  %v235_v52 = vld [vmem:[%s538_s2 + $0x38] sm:$0xff] }
   0xa   :  { %351 = vmatpush3.bf16.msra.mxu1 %v344_v7  ;;  %v234_v53 = vld [vmem:[%s538_s2 + $0x30] sm:$0xff] }
   0xc   :  { %317 = vmatmul.mubr.msk.f32.vlgmr.msra.gmra.mrb[0].mxu0 %vm34_vm0, %v15_v8 }
   0xd   :  { %329 = vmatmul.mubr.msk.f32.vlgmr.msra.gmra.mrb[0].mxu1 %vm34_vm0, %v23_v9  ;;  %319 = vmatprep.mubr.msk.f32.mxu0 %vm34_vm0, %v16_v10 }
   0xe   :  { %331 = vmatprep.mubr.msk.f32.mxu1 %vm34_vm0, %v24_v11 }
  0x10   :  { %320 = vmatmul.mubr.msk.f32.gmra.mrb[2].mxu0 %vm34_vm0, %v17_v12 }
  0x11   :  { %332 = vmatmul.mubr.msk.f32.gmra.mrb[2].mxu1 %vm34_vm0, %v25_v13  ;;  %322 = vmatprep.mubr.msk.f32.mxu0 %vm34_vm0, %v18_v14 }
  0x12   :  { %334 = vmatprep.mubr.msk.f32.mxu1 %vm34_vm0, %v26_v15 }
  0x14   :  { %323 = vmatmul.mubr.msk.f32.gmra.mrb[4].mxu0 %vm34_vm0, %v19_v16 }
  0x15   :  { %335 = vmatmul.mubr.msk.f32.gmra.mrb[4].mxu1 %vm34_vm0, %v27_v17  ;;  %325 = vmatprep.mubr.msk.f32.mxu0 %vm34_vm0, %v20_v18 }
  0x16   :  { %337 = vmatprep.mubr.msk.f32.mxu1 %vm34_vm0, %v28_v19 }
  0x18   :  { %326 = vmatmul.mubr.msk.f32.gmra.mrb[6].mxu0 %vm34_vm0, %v21_v20 }
  0x19   :  { %338 = vmatmul.mubr.msk.f32.gmra.mrb[6].mxu1 %vm34_vm0, %v29_v21 }
  0xdf   :  { %v318_v24 = vpop.f32.mrb[0].mxu0 }
  0xe0   :  { %v330_v25 = vpop.f32.mrb[0].mxu1  ;;  %v237_v26 = vadd.f32 %v318_v24, %v229_v22  ;;  %v149_v28 = vpop.f32.mrb[1].mxu0 }
  0xe1   :  { %v245_v27 = vadd.f32 %v330_v25, %v229_v22  ;;  %v189_v29 = vpop.f32.mrb[1].mxu1  ;;  %v236_v30 = vadd.f32 %v228_v23, %v149_v28 }
  0xe2   :  { %v244_v31 = vadd.f32 %v228_v23, %v189_v29  ;;  %253 = vst.msk [vmem:[%s539_s3 + $0x8] sm:$0xff] %vm34_vm0, %v237_v26 }
  0xe3   :  { %261 = vst.msk [vmem:[%s539_s3 + $0x48] sm:$0xff] %vm34_vm0, %v245_v27  ;;  %252 = vst.msk [vmem:[%s539_s3] sm:$0xff] %vm34_vm0, %v236_v30  ;;  %v321_v34 = vpop.f32.mrb[2].mxu0 }
  0xe4   :  { %260 = vst.msk [vmem:[%s539_s3 + $0x40] sm:$0xff] %vm34_vm0, %v244_v31  ;;  %v333_v35 = vpop.f32.mrb[2].mxu1  ;;  %v239_v36 = vadd.f32 %v321_v34, %v231_v32  ;;  %v159_v38 = vpop.f32.mrb[3].mxu0 }
  0xe5   :  { %v247_v37 = vadd.f32 %v333_v35, %v231_v32  ;;  %v199_v39 = vpop.f32.mrb[3].mxu1  ;;  %v238_v40 = vadd.f32 %v230_v33, %v159_v38 }
  0xe6   :  { %v246_v41 = vadd.f32 %v230_v33, %v199_v39  ;;  %255 = vst.msk [vmem:[%s539_s3 + $0x18] sm:$0xff] %vm34_vm0, %v239_v36 }
  0xe7   :  { %263 = vst.msk [vmem:[%s539_s3 + $0x58] sm:$0xff] %vm34_vm0, %v247_v37  ;;  %254 = vst.msk [vmem:[%s539_s3 + $0x10] sm:$0xff] %vm34_vm0, %v238_v40  ;;  %v324_v44 = vpop.f32.mrb[4].mxu0 }
  0xe8   :  { %262 = vst.msk [vmem:[%s539_s3 + $0x50] sm:$0xff] %vm34_vm0, %v246_v41  ;;  %v336_v45 = vpop.f32.mrb[4].mxu1  ;;  %v241_v46 = vadd.f32 %v324_v44, %v233_v42  ;;  %v169_v48 = vpop.f32.mrb[5].mxu0 }
  0xe9   :  { %v249_v47 = vadd.f32 %v336_v45, %v233_v42  ;;  %v209_v49 = vpop.f32.mrb[5].mxu1  ;;  %v240_v50 = vadd.f32 %v232_v43, %v169_v48 }
  0xea   :  { %v248_v51 = vadd.f32 %v232_v43, %v209_v49  ;;  %257 = vst.msk [vmem:[%s539_s3 + $0x28] sm:$0xff] %vm34_vm0, %v241_v46 }
  0xeb   :  { %265 = vst.msk [vmem:[%s539_s3 + $0x68] sm:$0xff] %vm34_vm0, %v249_v47  ;;  %256 = vst.msk [vmem:[%s539_s3 + $0x20] sm:$0xff] %vm34_vm0, %v240_v50  ;;  %v327_v54 = vpop.f32.mrb[6].mxu0 }
  0xec   :  { %264 = vst.msk [vmem:[%s539_s3 + $0x60] sm:$0xff] %vm34_vm0, %v248_v51  ;;  %v339_v55 = vpop.f32.mrb[6].mxu1  ;;  %v243_v56 = vadd.f32 %v327_v54, %v235_v52  ;;  %v179_v58 = vpop.f32.mrb[7].mxu0 }
  0xed   :  { %v251_v57 = vadd.f32 %v339_v55, %v235_v52  ;;  %v219_v59 = vpop.f32.mrb[7].mxu1  ;;  %v242_v60 = vadd.f32 %v234_v53, %v179_v58 }
  0xee   :  { %v250_v61 = vadd.f32 %v234_v53, %v219_v59  ;;  %259 = vst.msk [vmem:[%s539_s3 + $0x38] sm:$0xff] %vm34_vm0, %v243_v56 }
  0xef   :  { %267 = vst.msk [vmem:[%s539_s3 + $0x78] sm:$0xff] %vm34_vm0, %v251_v57  ;;  %258 = vst.msk [vmem:[%s539_s3 + $0x30] sm:$0xff] %vm34_vm0, %v242_v60 }
  0xf0   :  { %266 = vst.msk [vmem:[%s539_s3 + $0x70] sm:$0xff] %vm34_vm0, %v250_v61 }

// kernel: _embed_pallas.1
= control target key start
LH: loop header
LB: loop body
LE: loop exit
PB: predicated region body
PF: predicated region fallthrough
CT: control target
= control target key end

     0   :  { %vm34_vm0 = vcmask 261120   ;;  %s536_s1 = inlined_call_operand.vmem [shape: f32[32,32], index: 1, kind: input, shape index: {}]   ;;  %s537_s0 = inlined_call_operand.vmem [shape: f32[2,64,32], index: 0, kind: input, shape index: {}]   ;;  %s538_s2 = inlined_call_operand.vmem [shape: f32[1,64,32], index: 2, kind: input, shape index: {}]   ;;  %s539_s3 = inlined_call_operand.vmem [shape: f32[2,64,32], index: 3, kind: output, shape index: {}]  }
   0x1   :  { %v30_v0 = vld [vmem:[%s536_s1] sm:$0xff]  ;;  %v31_v1 = vld [vmem:[%s536_s1 + $0x8] sm:$0xff]  ;;  %v32_v2 = vld [vmem:[%s536_s1 + $0x10] sm:$0xff] }
   0x2   :  { %v340_v3 = vpack.c.bf16 %v31_v1, %v30_v0  ;;  %v33_v4 = vld [vmem:[%s536_s1 + $0x18] sm:$0xff]  ;;  %v14_v5 = vld [vmem:[%s537_s0] sm:$0xff]  ;;  %v15_v8 = vld [vmem:[%s537_s0 + $0x8] sm:$0xff] }
   0x3   :  { %v22_v6 = vld [vmem:[%s537_s0 + $0x40] sm:$0xff]  ;;  %v344_v7 = vpack.c.bf16 %v33_v4, %v32_v2  ;;  %316 = vmatprep.mubr.msk.f32.mxu0 %vm34_vm0, %v14_v5  ;;  %v23_v9 = vld [vmem:[%s537_s0 + $0x48] sm:$0xff]  ;;  %v16_v10 = vld [vmem:[%s537_s0 + $0x10] sm:$0xff] }
   0x4   :  { %328 = vmatprep.mubr.msk.f32.mxu1 %vm34_vm0, %v22_v6  ;;  %341 = vmatprep.subr.bf16.mxu0 %v340_v3  ;;  %v24_v11 = vld [vmem:[%s537_s0 + $0x50] sm:$0xff]  ;;  %v17_v12 = vld [vmem:[%s537_s0 + $0x18] sm:$0xff]  ;;  %v18_v14 = vld [vmem:[%s537_s0 + $0x20] sm:$0xff] }
   0x5   :  { %348 = vmatprep.subr.bf16.mxu1 %v340_v3  ;;  %343 = vmatpush3.bf16.msra.mxu0 %v340_v3  ;;  %v25_v13 = vld [vmem:[%s537_s0 + $0x58] sm:$0xff]  ;;  %v26_v15 = vld [vmem:[%s537_s0 + $0x60] sm:$0xff]  ;;  %v19_v16 = vld [vmem:[%s537_s0 + $0x28] sm:$0xff] }
   0x6   :  { %350 = vmatpush3.bf16.msra.mxu1 %v340_v3  ;;  %345 = vmatprep.subr.bf16.mxu0 %v344_v7  ;;  %v27_v17 = vld [vmem:[%s537_s0 + $0x68] sm:$0xff]  ;;  %v20_v18 = vld [vmem:[%s537_s0 + $0x30] sm:$0xff]  ;;  %v21_v20 = vld [vmem:[%s537_s0 + $0x38] sm:$0xff] }
   0x7   :  { %349 = vmatprep.subr.bf16.mxu1 %v344_v7  ;;  %v28_v19 = vld [vmem:[%s537_s0 + $0x70] sm:$0xff]  ;;  %v29_v21 = vld [vmem:[%s537_s0 + $0x78] sm:$0xff]  ;;  %v229_v22 = vld [vmem:[%s538_s2 + $0x8] sm:$0xff] }
   0x8   :  { %v228_v23 = vld [vmem:[%s538_s2] sm:$0xff]  ;;  %v231_v32 = vld [vmem:[%s538_s2 + $0x18] sm:$0xff]  ;;  %v230_v33 = vld [vmem:[%s538_s2 + $0x10] sm:$0xff] }
   0x9   :  { %347 = vmatpush3.bf16.msra.mxu0 %v344_v7  ;;  %v233_v42 = vld [vmem:[%s538_s2 + $0x28] sm:$0xff]  ;;  %v232_v43 = vld [vmem:[%s538_s2 + $0x20] sm:$0xff]  ;;  %v235_v52 = vld [vmem:[%s538_s2 + $0x38] sm:$0xff] }
   0xa   :  { %351 = vmatpush3.bf16.msra.mxu1 %v344_v7  ;;  %v234_v53 = vld [vmem:[%s538_s2 + $0x30] sm:$0xff] }
   0xc   :  { %317 = vmatmul.mubr.msk.f32.vlgmr.msra.gmra.mrb[0].mxu0 %vm34_vm0, %v15_v8 }
   0xd   :  { %329 = vmatmul.mubr.msk.f32.vlgmr.msra.gmra.mrb[0].mxu1 %vm34_vm0, %v23_v9  ;;  %319 = vmatprep.mubr.msk.f32.mxu0 %vm34_vm0, %v16_v10 }
   0xe   :  { %331 = vmatprep.mubr.msk.f32.mxu1 %vm34_vm0, %v24_v11 }
  0x10   :  { %320 = vmatmul.mubr.msk.f32.gmra.mrb[2].mxu0 %vm34_vm0, %v17_v12 }
  0x11   :  { %332 = vmatmul.mubr.msk.f32.gmra.mrb[2].mxu1 %vm34_vm0, %v25_v13  ;;  %322 = vmatprep.mubr.msk.f32.mxu0 %vm34_vm0, %v18_v14 }
  0x12   :  { %334 = vmatprep.mubr.msk.f32.mxu1 %vm34_vm0, %v26_v15 }
  0x14   :  { %323 = vmatmul.mubr.msk.f32.gmra.mrb[4].mxu0 %vm34_vm0, %v19_v16 }
  0x15   :  { %335 = vmatmul.mubr.msk.f32.gmra.mrb[4].mxu1 %vm34_vm0, %v27_v17  ;;  %325 = vmatprep.mubr.msk.f32.mxu0 %vm34_vm0, %v20_v18 }
  0x16   :  { %337 = vmatprep.mubr.msk.f32.mxu1 %vm34_vm0, %v28_v19 }
  0x18   :  { %326 = vmatmul.mubr.msk.f32.gmra.mrb[6].mxu0 %vm34_vm0, %v21_v20 }
  0x19   :  { %338 = vmatmul.mubr.msk.f32.gmra.mrb[6].mxu1 %vm34_vm0, %v29_v21 }
  0xdf   :  { %v318_v24 = vpop.f32.mrb[0].mxu0 }
  0xe0   :  { %v330_v25 = vpop.f32.mrb[0].mxu1  ;;  %v237_v26 = vadd.f32 %v318_v24, %v229_v22  ;;  %v149_v28 = vpop.f32.mrb[1].mxu0 }
  0xe1   :  { %v245_v27 = vadd.f32 %v330_v25, %v229_v22  ;;  %v189_v29 = vpop.f32.mrb[1].mxu1  ;;  %v236_v30 = vadd.f32 %v228_v23, %v149_v28 }
  0xe2   :  { %v244_v31 = vadd.f32 %v228_v23, %v189_v29  ;;  %253 = vst.msk [vmem:[%s539_s3 + $0x8] sm:$0xff] %vm34_vm0, %v237_v26 }
  0xe3   :  { %261 = vst.msk [vmem:[%s539_s3 + $0x48] sm:$0xff] %vm34_vm0, %v245_v27  ;;  %252 = vst.msk [vmem:[%s539_s3] sm:$0xff] %vm34_vm0, %v236_v30  ;;  %v321_v34 = vpop.f32.mrb[2].mxu0 }
  0xe4   :  { %260 = vst.msk [vmem:[%s539_s3 + $0x40] sm:$0xff] %vm34_vm0, %v244_v31  ;;  %v333_v35 = vpop.f32.mrb[2].mxu1  ;;  %v239_v36 = vadd.f32 %v321_v34, %v231_v32  ;;  %v159_v38 = vpop.f32.mrb[3].mxu0 }
  0xe5   :  { %v247_v37 = vadd.f32 %v333_v35, %v231_v32  ;;  %v199_v39 = vpop.f32.mrb[3].mxu1  ;;  %v238_v40 = vadd.f32 %v230_v33, %v159_v38 }
  0xe6   :  { %v246_v41 = vadd.f32 %v230_v33, %v199_v39  ;;  %255 = vst.msk [vmem:[%s539_s3 + $0x18] sm:$0xff] %vm34_vm0, %v239_v36 }
  0xe7   :  { %263 = vst.msk [vmem:[%s539_s3 + $0x58] sm:$0xff] %vm34_vm0, %v247_v37  ;;  %254 = vst.msk [vmem:[%s539_s3 + $0x10] sm:$0xff] %vm34_vm0, %v238_v40  ;;  %v324_v44 = vpop.f32.mrb[4].mxu0 }
  0xe8   :  { %262 = vst.msk [vmem:[%s539_s3 + $0x50] sm:$0xff] %vm34_vm0, %v246_v41  ;;  %v336_v45 = vpop.f32.mrb[4].mxu1  ;;  %v241_v46 = vadd.f32 %v324_v44, %v233_v42  ;;  %v169_v48 = vpop.f32.mrb[5].mxu0 }
  0xe9   :  { %v249_v47 = vadd.f32 %v336_v45, %v233_v42  ;;  %v209_v49 = vpop.f32.mrb[5].mxu1  ;;  %v240_v50 = vadd.f32 %v232_v43, %v169_v48 }
  0xea   :  { %v248_v51 = vadd.f32 %v232_v43, %v209_v49  ;;  %257 = vst.msk [vmem:[%s539_s3 + $0x28] sm:$0xff] %vm34_vm0, %v241_v46 }
  0xeb   :  { %265 = vst.msk [vmem:[%s539_s3 + $0x68] sm:$0xff] %vm34_vm0, %v249_v47  ;;  %256 = vst.msk [vmem:[%s539_s3 + $0x20] sm:$0xff] %vm34_vm0, %v240_v50  ;;  %v327_v54 = vpop.f32.mrb[6].mxu0 }
  0xec   :  { %264 = vst.msk [vmem:[%s539_s3 + $0x60] sm:$0xff] %vm34_vm0, %v248_v51  ;;  %v339_v55 = vpop.f32.mrb[6].mxu1  ;;  %v243_v56 = vadd.f32 %v327_v54, %v235_v52  ;;  %v179_v58 = vpop.f32.mrb[7].mxu0 }
  0xed   :  { %v251_v57 = vadd.f32 %v339_v55, %v235_v52  ;;  %v219_v59 = vpop.f32.mrb[7].mxu1  ;;  %v242_v60 = vadd.f32 %v234_v53, %v179_v58 }
  0xee   :  { %v250_v61 = vadd.f32 %v234_v53, %v219_v59  ;;  %259 = vst.msk [vmem:[%s539_s3 + $0x38] sm:$0xff] %vm34_vm0, %v243_v56 }
  0xef   :  { %267 = vst.msk [vmem:[%s539_s3 + $0x78] sm:$0xff] %vm34_vm0, %v251_v57  ;;  %258 = vst.msk [vmem:[%s539_s3 + $0x30] sm:$0xff] %vm34_vm0, %v242_v60 }
  0xf0   :  { %266 = vst.msk [vmem:[%s539_s3 + $0x70] sm:$0xff] %vm34_vm0, %v250_v61 }

</bundles_post_ra>
